<compile_context>
chip_gen: v7x
topology: tpu7x:2x2x1
jax: 0.10.0
libtpu: 0.0.40
codegen_flags: <defaults>
</compile_context>

<pallas_src>
import jax
import jax.numpy as jnp
import numpy as np
from jax.experimental import pallas as pl
from jax.experimental.pallas import tpu as pltpu


def policy_kernel(scalars_ref, x_ref, w1_ref, y_ref, o_ref):
    """Fused Linear(256->1,+bias) + Linear(1->1,no bias) + add + tanh.

    scalars_ref: (2,)       f32 SMEM      [affine1 bias, affine2 weight]
    x_ref      : (TB, 256)  x-dtype VMEM  input features (batch tile)
    w1_ref     : (1, 256)   f32 VMEM      affine1 weight, lane-dense (resident)
    y_ref      : (1, TB)    y-dtype VMEM  second input, lane-dense
    o_ref      : (1, TB)    f32 VMEM      action output, lane-dense
    """
    b1 = scalars_ref[0]                     # scalar reads (SMEM / sreg path)
    w2 = scalars_ref[1]

    tb = x_ref.shape[0]
    # Upcast in-kernel: HBM traffic stays at the caller's dtype width.
    x = x_ref[...].astype(jnp.float32)                        # (TB, 256)
    # 256->1 projection on the VPU: broadcast-mul then lane reduction (XLU).
    h1 = jnp.sum(x * w1_ref[...], axis=-1).reshape(1, tb)     # (1, TB)
    # affine2: Linear(1, 1, bias=False) is a scalar scale of y.
    h2 = y_ref[...].astype(jnp.float32) * w2                  # (1, TB)
    o_ref[...] = jnp.tanh(h1 + b1 + h2)                       # (1, TB)


def _round_up(n, m):
    return ((n + m - 1) // m) * m


def _max_tile_rows(x_itemsize, feature_dim):
    """Largest batch-tile row count whose double-buffered x tile comfortably
    fits the default scoped-VMEM limit on the current chip generation."""
    try:
        kind = jax.devices()[0].device_kind.lower()
    except Exception:
        kind = ""
    # v5e default scoped VMEM is 16 MiB -> cap the x buffer at 4 MiB
    # (8 MiB double-buffered); v6e/v7x defaults are 32 MiB -> 8 MiB buffers.
    budget = (4 << 20) if "v5" in kind else (8 << 20)
    rows = budget // (feature_dim * x_itemsize)
    return max(256, (rows // 256) * 256)


def _pick_tiling(B, x_itemsize, feature_dim):
    if B <= 1024:
        # Single full-array tile: block == full dims, so no (8,128) divisibility
        # requirement and no padding of any kind.
        return B, 1
    max_tb = _max_tile_rows(x_itemsize, feature_dim)
    # At least 2 balanced tiles (keeps both v7x TensorCores busy); each a
    # multiple of 256 rows so the (TB,256) / (1,TB) blocks satisfy (8,128)
    # tiling for both f32 and packed 16-bit dtypes.
    num_tiles = max(2, pl.cdiv(B, max_tb))
    tb = min(max_tb, _round_up(pl.cdiv(B, num_tiles), 256))
    return tb, pl.cdiv(B, tb)


def policy_forward(x, y, w1, b1, w2):
    """x: (B, 256), y: (B, 1), w1: (1, 256), b1: (1,), w2: (1, 1) -> (B, 1) f32."""
    B, D = x.shape
    TB, num_tiles = _pick_tiling(B, jnp.dtype(x.dtype).itemsize, D)

    # Parameters are tiny: keep w1 lane-dense as (1, 256) f32 (resident across
    # grid steps) and pack the two true scalars into a single SMEM array.
    w1_row = w1.reshape(1, D).astype(jnp.float32)
    scalars = jnp.concatenate(
        [b1.reshape(-1), w2.reshape(-1)]).astype(jnp.float32)     # (2,)

    # x and y go in at their native dtype and original size: no wrapper-side
    # astype / pad copies (the kernel is HBM-bandwidth bound).
    y_flat = y.reshape(1, B)       # contiguous (B,1)->(1,B): no data movement

    out = pl.pallas_call(
        policy_kernel,
        out_shape=jax.ShapeDtypeStruct((1, B), jnp.float32),
        grid=(num_tiles,),
        in_specs=[
            pl.BlockSpec(memory_space=pltpu.MemorySpace.SMEM),    # scalars
            pl.BlockSpec((TB, D), lambda i: (i, 0)),              # x tile
            pl.BlockSpec((1, D), lambda i: (0, 0)),               # w1 resident
            pl.BlockSpec((1, TB), lambda i: (0, i)),              # y tile
        ],
        out_specs=pl.BlockSpec((1, TB), lambda i: (0, i)),
        compiler_params=pltpu.CompilerParams(
            dimension_semantics=("parallel",)),
    )(scalars, x, w1_row, y_flat)

    return out.reshape(B, 1)


def policy_ref(x, y, w1, b1, w2):
    """Pure-JAX reference matching the PyTorch forward (f32-accurate)."""
    h1 = jnp.dot(x, w1.T, precision=jax.lax.Precision.HIGHEST) + b1
    h2 = jnp.dot(y, w2.T, precision=jax.lax.Precision.HIGHEST)
    return jnp.tanh(h1 + h2)


if __name__ == "__main__":
    key = jax.random.PRNGKey(0)
    k_x, k_y, k_w1, k_b1, k_w2 = jax.random.split(key, 5)

    D = 256

    # Deterministic parameter init mirroring the module's __init__:
    #   affine1.weight: (1, 256), xavier_uniform -> U(-a, a), a = sqrt(6/(256+1))
    #   affine1.bias:   (1,),     PyTorch default U(-1/sqrt(256), 1/sqrt(256))
    #   affine2.weight: (1, 1),   xavier_uniform -> a = sqrt(6/2)
    a1 = float(np.sqrt(6.0 / (256 + 1)))
    w1 = jax.random.uniform(k_w1, (1, D), jnp.float32, -a1, a1)
    bb = 1.0 / float(np.sqrt(D))
    b1 = jax.random.uniform(k_b1, (1,), jnp.float32, -bb, bb)
    a2 = float(np.sqrt(6.0 / 2.0))
    w2 = jax.random.uniform(k_w2, (1, 1), jnp.float32, -a2, a2)

    # 1) Primary small-shape check (f32, single full-array tile).
    B = 8
    x = jax.random.normal(k_x, (B, D), jnp.float32)
    y = jax.random.normal(k_y, (B, 1), jnp.float32)
    out = jax.block_until_ready(policy_forward(x, y, w1, b1, w2))
    np.testing.assert_allclose(
        np.asarray(out), np.asarray(policy_ref(x, y, w1, b1, w2)),
        rtol=1e-5, atol=1e-5)
    assert out.shape == (B, 1)

    # 2) Native-bf16 pass-through (no wrapper-side astype copy; in-kernel upcast).
    Bb = 32
    xb = jax.random.normal(k_x, (Bb, D), jnp.float32).astype(jnp.bfloat16)
    yb = jax.random.normal(k_y, (Bb, 1), jnp.float32).astype(jnp.bfloat16)
    outb = jax.block_until_ready(policy_forward(xb, yb, w1, b1, w2))
    refb = policy_ref(xb.astype(jnp.float32), yb.astype(jnp.float32), w1, b1, w2)
    np.testing.assert_allclose(np.asarray(outb), np.asarray(refb),
                               rtol=1e-4, atol=1e-4)

    # 3) Ragged multi-tile path (no wrapper-side jnp.pad; partial last block,
    #    >=2 balanced "parallel" tiles).
    Br = 1500
    xr = jax.random.normal(k_x, (Br, D), jnp.float32)
    yr = jax.random.normal(k_y, (Br, 1), jnp.float32)
    outr = jax.block_until_ready(policy_forward(xr, yr, w1, b1, w2))
    np.testing.assert_allclose(
        np.asarray(outr), np.asarray(policy_ref(xr, yr, w1, b1, w2)),
        rtol=1e-5, atol=1e-5)

    print("KERNEL_OK")
</pallas_src>

<mosaic_0001>
module attributes {stable_mosaic.version = 11 : i64} {
  func.func @policy_kernel(%arg0: i32, %arg1: memref<2xf32, #tpu.memory_space<smem>>, %arg2: memref<8x256xf32, #tpu.memory_space<vmem>>, %arg3: memref<1x256xf32, #tpu.memory_space<vmem>>, %arg4: memref<1x8xf32, #tpu.memory_space<vmem>>, %arg5: memref<1x8xf32, #tpu.memory_space<vmem>>) attributes {dimension_semantics = [#tpu.dimension_semantics<parallel>], iteration_bounds = array<i64: 1>, scalar_prefetch = 0 : i64, scratch_operands = 0 : i64, tpu.core_type = #tpu.core_type<tc>, window_params = [{transform_indices = @transform_0, window_bounds = array<i64: 2>}, {transform_indices = @transform_1, window_bounds = array<i64: 8, 256>}, {pipeline_mode = #tpu.pipeline_mode<synchronous>, transform_indices = @transform_2, window_bounds = array<i64: 1, 256>}, {transform_indices = @transform_3, window_bounds = array<i64: 1, 8>}, {transform_indices = @transform_4, window_bounds = array<i64: 1, 8>}]} {
    %c0 = arith.constant 0 : index
    %0 = memref.load %arg1[%c0] : memref<2xf32, #tpu.memory_space<smem>>
    %c1 = arith.constant 1 : index
    %1 = memref.load %arg1[%c1] : memref<2xf32, #tpu.memory_space<smem>>
    %c0_0 = arith.constant 0 : index
    %c0_1 = arith.constant 0 : index
    %2 = vector.load %arg2[%c0_0, %c0_1] : memref<8x256xf32, #tpu.memory_space<vmem>>, vector<8x256xf32>
    %c0_2 = arith.constant 0 : index
    %c0_3 = arith.constant 0 : index
    %3 = vector.load %arg3[%c0_2, %c0_3] : memref<1x256xf32, #tpu.memory_space<vmem>>, vector<1x256xf32>
    %4 = vector.broadcast %3 : vector<1x256xf32> to vector<8x256xf32>
    %5 = arith.mulf %2, %4 : vector<8x256xf32>
    %cst = arith.constant dense<0.000000e+00> : vector<8xf32>
    %6 = vector.multi_reduction <add>, %5, %cst [1] : vector<8x256xf32> to vector<8xf32>
    %7 = vector.shape_cast %6 : vector<8xf32> to vector<1x8xf32>
    %c0_4 = arith.constant 0 : index
    %c0_5 = arith.constant 0 : index
    %8 = vector.load %arg4[%c0_4, %c0_5] : memref<1x8xf32, #tpu.memory_space<vmem>>, vector<1x8xf32>
    %9 = vector.broadcast %1 : f32 to vector<1x8xf32>
    %10 = arith.mulf %8, %9 : vector<1x8xf32>
    %11 = vector.broadcast %0 : f32 to vector<1x8xf32>
    %12 = arith.addf %7, %11 : vector<1x8xf32>
    %13 = arith.addf %12, %10 : vector<1x8xf32>
    %14 = math.tanh %13 : vector<1x8xf32>
    %c0_6 = arith.constant 0 : index
    %c0_7 = arith.constant 0 : index
    %15 = vector.load %arg5[%c0_6, %c0_7] : memref<1x8xf32, #tpu.memory_space<vmem>>, vector<1x8xf32>
    tpu.vector_store %arg5[%c0_6, %c0_7], %14 {strides = array<i32>} : memref<1x8xf32, #tpu.memory_space<vmem>>, vector<1x8xf32>,
    return
  }
  func.func @transform_0(%arg0: i32) -> i32 {
    %c0_i32 = arith.constant 0 : i32
    %c0_i32_0 = arith.constant 0 : i32
    return %c0_i32 : i32
  }
  func.func @transform_1(%arg0: i32) -> (i32, i32) {
    %c0_i32 = arith.constant 0 : i32
    %c0_i32_0 = arith.constant 0 : i32
    return %arg0, %c0_i32 : i32, i32
  }
  func.func @transform_2(%arg0: i32) -> (i32, i32) {
    %c0_i32 = arith.constant 0 : i32
    %c0_i32_0 = arith.constant 0 : i32
    %c0_i32_1 = arith.constant 0 : i32
    return %c0_i32, %c0_i32_0 : i32, i32
  }
  func.func @transform_3(%arg0: i32) -> (i32, i32) {
    %c0_i32 = arith.constant 0 : i32
    %c0_i32_0 = arith.constant 0 : i32
    return %c0_i32, %arg0 : i32, i32
  }
  func.func @transform_4(%arg0: i32) -> (i32, i32) {
    %c0_i32 = arith.constant 0 : i32
    %c0_i32_0 = arith.constant 0 : i32
    return %c0_i32, %arg0 : i32, i32
  }
}

</mosaic_0001>

<bundles_post_ra>
// kernel: tpu_custom_call.1
= control target key start
LH: loop header
LB: loop body
LE: loop exit
PB: predicated region body
PF: predicated region fallthrough
CT: control target
= control target key end

     0   :  { %9 = vsyncpa [#allocation5], 0  ;;  %s247_s0 = inlined_call_operand.hbm [shape: f32[2], index: 0, kind: input, shape index: {}]   ;;  %s248_s1 = inlined_call_operand.hbm [shape: f32[8,256], index: 1, kind: input, shape index: {}]   ;;  %s249_s2 = inlined_call_operand.vmem [shape: f32[1,256], index: 2, kind: input, shape index: {}]   ;;  %s250_s3 = inlined_call_operand.vmem [shape: f32[1,8], index: 3, kind: input, shape index: {}]   ;;  %s251_s4 = inlined_call_operand.hbm [shape: f32[1,8], index: 4, kind: output, shape index: {}]  }
   0x1   :  { %10 = vsyncpa [#allocation3], 0 }
   0x2   :  { %11 = vsyncpa [#allocation4], 0  ;;  %s116_s17 = scalar_lea.hbm %s247_s0, 16 }
   0x3   :  { %p117_p0 = scmp.ne.s32.totalorder %s247_s0, %s116_s17  ;;  %p120_p1 = scmp.lt.u32.totalorder %s116_s17, %s247_s0 }
   0x5   :  { %p122_p2 = pnand %p120_p1, %p117_p0 }
   0x7   :  { %125 = shalt.err (!%p122_p2)
}
   0x8   :  { %s176_s22 = smov [#allocation2]   ;;  %s177_s25 = smov [#allocation6]  }
   0x9   :  { %19 = dma.hbm_to_smem %s247_s0, 16, %s176_s22, [#allocation5]  }
   0xa   :  { %s26_s26 = sshll.u32 %s177_s25, 4  ;;  %s126_s29 = scalar_lea.hbm %s248_s1, 256  ;;  %s27_s26 = int_to_ptr.vmem [resolvable:$true] %s26_s26 }
   0xb   :  { %p127_p3 = scmp.ne.s32.totalorder %s248_s1, %s126_s29  ;;  %p130_p4 = scmp.lt.u32.totalorder %s126_s29, %s248_s1 }
   0xd   :  { %p132_p5 = pnand %p130_p4, %p127_p3 }
   0xf   :  { %135 = shalt.err (!%p132_p5)
}
  0x10   :  { %s136_s8 = scalar_lea.vmem %s27_s26, 256  ;;  %p141_p7 = scmp.lt.s32.totalorder %s27_s26, %s27_s26 }
  0x11   :  { %p137_p6 = scmp.ne.s32.totalorder %s27_s26, %s136_s8  ;;  %p142_p8 = scmp.lt.s32.totalorder %s136_s8, %s136_s8 }
  0x13   :  { %p143_p9 = por %p142_p8, %p141_p7 }
  0x15   :  { %p144_p10 = pnand %p143_p9, %p137_p6 }
  0x17   :  { %147 = shalt.err (!%p144_p10)
}
  0x18   :  { %29 = dma.hbm_to_vmem [thread:$0]  %s248_s1, 256, %s27_s26, [#allocation3]  }
  0x19   :  { %170 = dma.done.wait [#allocation5], 16  }
  0x1a   :  { %171 = vsyncadd [#allocation5], 4294967280 }
  0x1b   :  { %172 = dma.done.wait [#allocation3], 256  }
  0x1c   :  { %173 = vsyncadd [#allocation3], 4294967040 }
  0x1d   :  { %40 = sfence }
  0x1e   :  { %v47_v0 = vlaneseq  ;;  %v45_v2 = vld [vmem:[%s249_s2] sm:$0x3]  ;;  %v43_v5 = vld [vmem:[#allocation6] sm:$0xff]  ;;  %v44_v6 = vld [vmem:[#allocation6 + $0x8] sm:$0xff]  ;;  %s107_s1 = sld [smem:[#allocation2 + $0x1]]  ;;  %v178_v16 = vmov 0  }
  0x1f   :  { %v62_v12 = vld [vmem:[%s250_s3] sm:$0x1]  ;;  %112 = vset.pattern.permute.xlu1 %v178_v16  ;;  %113 = vset.pattern.permute.xlu0 %v178_v16  ;;  %s41_s2 = sld [smem:[#allocation2]]  ;;  %s179_s14 = smov [#allocation7]   ;;  %vm89_vm0 = vcmask 57344  }
  0x20   :  { %v48_v1 = vshrl.u32 %v47_v0, 7  ;;  %v83_v17 = vand.u32 127, %v47_v0  ;;  %s97_s3 = sshll.u32 %s179_s14, 4  ;;  %s98_s3 = int_to_ptr.vmem [resolvable:$true] %s97_s3 }
  0x21   :  { %s148_s15 = scalar_lea.vmem %s98_s3, 16  ;;  %s152_s16 = scalar_lea.vmem %s98_s3, 32 }
  0x22   :  { %v49_v3 = vsub.s32 0, %v48_v1  ;;  %v53_v4 = vsub.s32 1, %v48_v1  ;;  %v86_v18 = vsub.s32 %v83_v17, %v48_v1  ;;  %p149_p11 = scmp.ne.s32.totalorder %s98_s3, %s148_s15  ;;  %p153_p12 = scmp.lt.s32.totalorder %s98_s3, %s98_s3 }
  0x23   :  { %p154_p13 = scmp.lt.s32.totalorder %s152_s16, %s148_s15 }
  0x24   :  { %v50_v7 = vrot.slane %v45_v2, %v49_v3  ;;  %v54_v8 = vrot.slane %v45_v2, %v53_v4  ;;  %v63_v13 = vstv %s107_s1 }
  0x25   :  { %v64_v14 = vmul.f32 %v63_v13, %v62_v12  ;;  %v65_v20 = vstv %s41_s2  ;;  %p155_p0 = por %p154_p13, %p153_p12 }
  0x26   :  { %v57_v9 = vmul.f32 %v50_v7, %v43_v5  ;;  %v58_v10 = vmul.f32 %v54_v8, %v44_v6 }
  0x27   :  { %v71_v15 = vrot.slane %v64_v14, %v49_v3  ;;  %p156_p1 = pnand %p155_p0, %p149_p11 }
  0x28   :  { %v59_v11 = vadd.f32 %v58_v10, %v57_v9 }
  0x2a   :  { %60 = vadd.xlane.f32.xlu0 %v59_v11 }
  0x40   :  { %73 = vbcast.lane.b32.xlu0 %v71_v15, 256 }
  0xb7   :  { %v61_v19 = vpop.xlane.xlu0 %60 }
  0xb8   :  { %v66_v21 = vadd.f32 %v65_v20, %v61_v19 }
  0xbb   :  { %v74_v22 = vpop.permute.xlu0 %73 }
  0xbc   :  { %v76_v23 = vadd.f32 %v74_v22, %v66_v21 }
  0xbe   :  { %114 = vtanh.f32 %v76_v23 }
  0xc8   :  { %v115_v24 = vpop.eup %114 }
  0xc9   :  { %80 = vperm.xlu1 %112, %v115_v24  }
 0x148   :  { %v81_v25 = vpop.permute.xlu1 %80 }
 0x149   :  { %v87_v26 = vrot.slane %v81_v25, %v86_v18 }
 0x14b   :  { %90 = vst.msk [vmem:[#allocation7] sm:$0x1] %vm89_vm0, %v87_v26 }
 0x14c   :  { %159 = shalt.err (!%p156_p1)
}
 0x14d   :  { %s160_s19 = scalar_lea.hbm %s251_s4, 16 }
 0x14e   :  { %p161_p2 = scmp.ne.s32.totalorder %s251_s4, %s160_s19  ;;  %p164_p3 = scmp.lt.u32.totalorder %s160_s19, %s251_s4 }
 0x150   :  { %p166_p4 = pnand %p164_p3, %p161_p2 }
 0x152   :  { %169 = shalt.err (!%p166_p4)
}
 0x153   :  { %100 = dma.vmem_to_hbm [thread:$0]  %s98_s3, 16, %s251_s4, [#allocation4]  }
 0x154   :  { %174 = dma.done.wait [#allocation4], 16  }
 0x155   :  { %175 = vsyncadd [#allocation4], 4294967280 }
 0x156   :  { %104 = vsyncpa [#allocation3], 1 }
 0x157   :  { %105 = vsyncpa [#allocation4], 1 }
 0x158   :  { %106 = vsyncpa [#allocation5], 1 }

</bundles_post_ra>
